<compile_context>
chip_gen: v7x
topology: tpu7x:2x2x1
jax: 0.10.0
libtpu: 0.0.40
codegen_flags: <defaults>
</compile_context>

<pallas_src>
import functools

import jax
import jax.numpy as jnp
from jax.experimental import pallas as pl
from jax.experimental.pallas import tpu as pltpu


# (C_in, C_out) of the 6 conv(k=1) layers + the 2 linear layers of the value head.
LAYER_DIMS = [(6, 8), (8, 16), (16, 32), (32, 64), (64, 128), (128, 256),
              (256, 100), (100, 5)]
N_LAYERS = len(LAYER_DIMS)

# Padded compute dims: 100 -> 128, final 5 -> 8 (zero padding, exact).
PAD_CIN = [6, 8, 16, 32, 64, 128, 256, 128]
PAD_COUT = [8, 16, 32, 64, 128, 256, 128, 8]

FLOPS_PER_ROW = 2 * sum(ci * co for ci, co in LAYER_DIMS)
PARAM_BYTES = sum(co * ci * 2 + co * 4 for co, ci in zip(PAD_COUT, PAD_CIN))


def _round_up(v, m):
    return ((v + m - 1) // m) * m


def _pick_tile(n_pad, tile_n):
    """Largest 128-multiple tile that divides n_pad, capped at tile_n, with >=2
    grid steps whenever n_pad allows it (so both v7x TensorCores are used)."""
    units = n_pad // 128
    cap = max(1, tile_n // 128)
    if units >= 2:
        cap = min(cap, units // 2)          # force at least 2 grid steps
    best = 1
    for u in range(1, cap + 1):
        if units % u == 0:
            best = u
    return 128 * best


def dqn_kernel(x_ref, *refs):
    """x_ref: (6, TILE) bf16; refs = 8 weight refs (co,ci) bf16, 8 bias refs (co,1)
    f32, out_ref (8, TILE) f32. Activations stay (C, TILE): batch on the lane axis."""
    w_refs = refs[:N_LAYERS]
    b_refs = refs[N_LAYERS:2 * N_LAYERS]
    out_ref = refs[2 * N_LAYERS]

    h = x_ref[...]                                            # (6, TILE) bf16
    for li in range(N_LAYERS):
        # bf16 x bf16 -> f32 accumulate on the MXU; bias/ReLU in f32 (v5e-safe).
        h = jnp.dot(w_refs[li][...], h,
                    preferred_element_type=jnp.float32) + b_refs[li][...]
        if li < N_LAYERS - 1:
            # ReLU, then carry the activation in bf16 (next matmul operand dtype).
            h = jnp.maximum(h, 0.0).astype(jnp.bfloat16)
    out_ref[...] = h                                          # (8, TILE) f32


def init_params(key):
    """Synthetic params in PyTorch layout: w (C_out, C_in), b (C_out,)."""
    params = []
    for cin, cout in LAYER_DIMS:
        key, kw, kb = jax.random.split(key, 3)
        limit = jnp.sqrt(6.0 / (cin + cout))
        w = jax.random.uniform(kw, (cout, cin), jnp.float32, -limit, limit)
        b = jax.random.uniform(kb, (cout,), jnp.float32, -0.1, 0.1)
        params.append((w, b))
    return params


def pad_params(params):
    """Zero-pad each layer to its padded dims; weights bf16, biases f32 columns."""
    w_list, b_list = [], []
    for (w, b), co_p, ci_p in zip(params, PAD_COUT, PAD_CIN):
        co, ci = w.shape
        w_pad = jnp.zeros((co_p, ci_p), jnp.float32).at[:co, :ci].set(w)
        b_pad = jnp.zeros((co_p, 1), jnp.float32).at[:co, 0].set(b)
        w_list.append(w_pad.astype(jnp.bfloat16))
        b_list.append(b_pad)
    return w_list, b_list


@functools.partial(jax.jit, static_argnames=("tile_n",))
def dqn_forward(x, w_list, b_list, *, tile_n=8192):
    """x: any shape with total elements divisible by 6 (matches x.view(-1, 6, 1)).
    Returns (N, 5) f32. jit ensures the pad/transpose/cast fuse into one pass."""
    x2d = x.reshape(-1, 6)                                    # (N, 6)
    n = x2d.shape[0]
    n_pad = _round_up(n, 128)                                 # pad batch to 128 only
    tile = _pick_tile(n_pad, tile_n)
    n_steps = n_pad // tile

    # (6, N_pad) bf16: lane = batch, bf16 halves input DMA (matches reference cast).
    x_t = jnp.pad(x2d, ((0, n_pad - n), (0, 0))).T.astype(jnp.bfloat16)

    x_spec = pl.BlockSpec((6, tile), lambda i: (0, i))        # pipelined over batch
    w_specs = [pl.BlockSpec((PAD_COUT[l], PAD_CIN[l]), lambda i: (0, 0))
               for l in range(N_LAYERS)]                      # resident, DMA'd once
    b_specs = [pl.BlockSpec((PAD_COUT[l], 1), lambda i: (0, 0))
               for l in range(N_LAYERS)]                      # resident, DMA'd once

    out = pl.pallas_call(
        dqn_kernel,
        out_shape=jax.ShapeDtypeStruct((8, n_pad), jnp.float32),
        grid_spec=pltpu.PrefetchScalarGridSpec(
            num_scalar_prefetch=0,
            grid=(n_steps,),
            in_specs=[x_spec] + w_specs + b_specs,
            out_specs=pl.BlockSpec((8, tile), lambda i: (0, i)),
        ),
        compiler_params=pltpu.CompilerParams(
            dimension_semantics=("parallel",),                # megacore split on v7x
            vmem_limit_bytes=48 * 1024 * 1024,                # big tiles on v5e; <64MiB v7x
        ),
        cost_estimate=pl.CostEstimate(
            flops=FLOPS_PER_ROW * n_pad,
            transcendentals=0,
            bytes_accessed=n_pad * (6 * 2 + 8 * 4) + PARAM_BYTES),
    )(x_t, *w_list, *b_list)
    return out[:5, :n].T                                      # (N, 5)


def dqn_reference(x, params):
    """Pure-JAX reference replicating bf16 matmul operands + f32 accumulate."""
    h = x.reshape(-1, 6).astype(jnp.float32)
    for i, (w, b) in enumerate(params):
        h = jax.lax.dot_general(
            h.astype(jnp.bfloat16), w.astype(jnp.bfloat16),
            (((1,), (1,)), ((), ())),
            preferred_element_type=jnp.float32) + b[None, :]
        if i < N_LAYERS - 1:
            h = jnp.maximum(h, 0.0)
    return h


if __name__ == "__main__":
    key = jax.random.PRNGKey(0)
    kx, kp = jax.random.split(key)

    # Input consistent with forward: x.view(-1, 6, 1) -> N = 2*4 = 8 rows.
    x = jax.random.normal(kx, (2, 4, 6), dtype=jnp.float32)
    params = init_params(kp)
    w_list, b_list = pad_params(params)

    out = dqn_forward(x, w_list, b_list)
    out = jax.block_until_ready(out)

    ref = dqn_reference(x, params)
    assert out.shape == (8, 5), out.shape
    assert jnp.allclose(out, ref, atol=1e-2, rtol=1e-2), "mismatch vs reference"

    print("KERNEL_OK")
</pallas_src>

<mosaic_0001>
module attributes {stable_mosaic.version = 11 : i64} {
  func.func @dqn_kernel(%arg0: i32, %arg1: memref<6x128xbf16, #tpu.memory_space<vmem>>, %arg2: memref<8x6xbf16, #tpu.memory_space<vmem>>, %arg3: memref<16x8xbf16, #tpu.memory_space<vmem>>, %arg4: memref<32x16xbf16, #tpu.memory_space<vmem>>, %arg5: memref<64x32xbf16, #tpu.memory_space<vmem>>, %arg6: memref<128x64xbf16, #tpu.memory_space<vmem>>, %arg7: memref<256x128xbf16, #tpu.memory_space<vmem>>, %arg8: memref<128x256xbf16, #tpu.memory_space<vmem>>, %arg9: memref<8x128xbf16, #tpu.memory_space<vmem>>, %arg10: memref<8x1xf32, #tpu.memory_space<vmem>>, %arg11: memref<16x1xf32, #tpu.memory_space<vmem>>, %arg12: memref<32x1xf32, #tpu.memory_space<vmem>>, %arg13: memref<64x1xf32, #tpu.memory_space<vmem>>, %arg14: memref<128x1xf32, #tpu.memory_space<vmem>>, %arg15: memref<256x1xf32, #tpu.memory_space<vmem>>, %arg16: memref<128x1xf32, #tpu.memory_space<vmem>>, %arg17: memref<8x1xf32, #tpu.memory_space<vmem>>, %arg18: memref<8x128xf32, #tpu.memory_space<vmem>>) attributes {dimension_semantics = [#tpu.dimension_semantics<parallel>], iteration_bounds = array<i64: 1>, scalar_prefetch = 0 : i64, scratch_operands = 0 : i64, tpu.core_type = #tpu.core_type<tc>, window_params = [{transform_indices = @transform_0, window_bounds = array<i64: 6, 128>}, {pipeline_mode = #tpu.pipeline_mode<synchronous>, transform_indices = @transform_1, window_bounds = array<i64: 8, 6>}, {pipeline_mode = #tpu.pipeline_mode<synchronous>, transform_indices = @transform_2, window_bounds = array<i64: 16, 8>}, {pipeline_mode = #tpu.pipeline_mode<synchronous>, transform_indices = @transform_3, window_bounds = array<i64: 32, 16>}, {pipeline_mode = #tpu.pipeline_mode<synchronous>, transform_indices = @transform_4, window_bounds = array<i64: 64, 32>}, {pipeline_mode = #tpu.pipeline_mode<synchronous>, transform_indices = @transform_5, window_bounds = array<i64: 128, 64>}, {pipeline_mode = #tpu.pipeline_mode<synchronous>, transform_indices = @transform_6, window_bounds = array<i64: 256, 128>}, {pipeline_mode = #tpu.pipeline_mode<synchronous>, transform_indices = @transform_7, window_bounds = array<i64: 128, 256>}, {pipeline_mode = #tpu.pipeline_mode<synchronous>, transform_indices = @transform_8, window_bounds = array<i64: 8, 128>}, {pipeline_mode = #tpu.pipeline_mode<synchronous>, transform_indices = @transform_9, window_bounds = array<i64: 8, 1>}, {pipeline_mode = #tpu.pipeline_mode<synchronous>, transform_indices = @transform_10, window_bounds = array<i64: 16, 1>}, {pipeline_mode = #tpu.pipeline_mode<synchronous>, transform_indices = @transform_11, window_bounds = array<i64: 32, 1>}, {pipeline_mode = #tpu.pipeline_mode<synchronous>, transform_indices = @transform_12, window_bounds = array<i64: 64, 1>}, {pipeline_mode = #tpu.pipeline_mode<synchronous>, transform_indices = @transform_13, window_bounds = array<i64: 128, 1>}, {pipeline_mode = #tpu.pipeline_mode<synchronous>, transform_indices = @transform_14, window_bounds = array<i64: 256, 1>}, {pipeline_mode = #tpu.pipeline_mode<synchronous>, transform_indices = @transform_15, window_bounds = array<i64: 128, 1>}, {pipeline_mode = #tpu.pipeline_mode<synchronous>, transform_indices = @transform_16, window_bounds = array<i64: 8, 1>}, {transform_indices = @transform_17, window_bounds = array<i64: 8, 128>}]} {
    %c0 = arith.constant 0 : index
    %c0_0 = arith.constant 0 : index
    %0 = vector.load %arg1[%c0, %c0_0] : memref<6x128xbf16, #tpu.memory_space<vmem>>, vector<6x128xbf16>
    %c0_1 = arith.constant 0 : index
    %c0_2 = arith.constant 0 : index
    %1 = vector.load %arg2[%c0_1, %c0_2] : memref<8x6xbf16, #tpu.memory_space<vmem>>, vector<8x6xbf16>
    %cst = arith.constant dense<0.000000e+00> : vector<8x128xf32>
    %2 = tpu.matmul %1, %0, %cst {dimension_numbers = #tpu.dot_dimension_numbers<[1], [0], [0], [1], [0, 0, 1, 1], [], []>} : vector<8x6xbf16>, vector<6x128xbf16>, vector<8x128xf32> -> vector<8x128xf32>
    %c0_3 = arith.constant 0 : index
    %c0_4 = arith.constant 0 : index
    %3 = vector.load %arg10[%c0_3, %c0_4] : memref<8x1xf32, #tpu.memory_space<vmem>>, vector<8x1xf32>
    %4 = vector.broadcast %3 : vector<8x1xf32> to vector<8x128xf32>
    %5 = arith.addf %2, %4 : vector<8x128xf32>
    %cst_5 = arith.constant 0.000000e+00 : f32
    %6 = vector.broadcast %cst_5 : f32 to vector<8x128xf32>
    %7 = arith.maximumf %5, %6 : vector<8x128xf32>
    %8 = arith.truncf %7 : vector<8x128xf32> to vector<8x128xbf16>
    %c0_6 = arith.constant 0 : index
    %c0_7 = arith.constant 0 : index
    %9 = vector.load %arg3[%c0_6, %c0_7] : memref<16x8xbf16, #tpu.memory_space<vmem>>, vector<16x8xbf16>
    %cst_8 = arith.constant dense<0.000000e+00> : vector<16x128xf32>
    %10 = tpu.matmul %9, %8, %cst_8 {dimension_numbers = #tpu.dot_dimension_numbers<[1], [0], [0], [1], [0, 0, 1, 1], [], []>} : vector<16x8xbf16>, vector<8x128xbf16>, vector<16x128xf32> -> vector<16x128xf32>
    %c0_9 = arith.constant 0 : index
    %c0_10 = arith.constant 0 : index
    %11 = vector.load %arg11[%c0_9, %c0_10] : memref<16x1xf32, #tpu.memory_space<vmem>>, vector<16x1xf32>
    %12 = vector.broadcast %11 : vector<16x1xf32> to vector<16x128xf32>
    %13 = arith.addf %10, %12 : vector<16x128xf32>
    %cst_11 = arith.constant 0.000000e+00 : f32
    %14 = vector.broadcast %cst_11 : f32 to vector<16x128xf32>
    %15 = arith.maximumf %13, %14 : vector<16x128xf32>
    %16 = arith.truncf %15 : vector<16x128xf32> to vector<16x128xbf16>
    %c0_12 = arith.constant 0 : index
    %c0_13 = arith.constant 0 : index
    %17 = vector.load %arg4[%c0_12, %c0_13] : memref<32x16xbf16, #tpu.memory_space<vmem>>, vector<32x16xbf16>
    %cst_14 = arith.constant dense<0.000000e+00> : vector<32x128xf32>
    %18 = tpu.matmul %17, %16, %cst_14 {dimension_numbers = #tpu.dot_dimension_numbers<[1], [0], [0], [1], [0, 0, 1, 1], [], []>} : vector<32x16xbf16>, vector<16x128xbf16>, vector<32x128xf32> -> vector<32x128xf32>
    %c0_15 = arith.constant 0 : index
    %c0_16 = arith.constant 0 : index
    %19 = vector.load %arg12[%c0_15, %c0_16] : memref<32x1xf32, #tpu.memory_space<vmem>>, vector<32x1xf32>
    %20 = vector.broadcast %19 : vector<32x1xf32> to vector<32x128xf32>
    %21 = arith.addf %18, %20 : vector<32x128xf32>
    %cst_17 = arith.constant 0.000000e+00 : f32
    %22 = vector.broadcast %cst_17 : f32 to vector<32x128xf32>
    %23 = arith.maximumf %21, %22 : vector<32x128xf32>
    %24 = arith.truncf %23 : vector<32x128xf32> to vector<32x128xbf16>
    %c0_18 = arith.constant 0 : index
    %c0_19 = arith.constant 0 : index
    %25 = vector.load %arg5[%c0_18, %c0_19] : memref<64x32xbf16, #tpu.memory_space<vmem>>, vector<64x32xbf16>
    %cst_20 = arith.constant dense<0.000000e+00> : vector<64x128xf32>
    %26 = tpu.matmul %25, %24, %cst_20 {dimension_numbers = #tpu.dot_dimension_numbers<[1], [0], [0], [1], [0, 0, 1, 1], [], []>} : vector<64x32xbf16>, vector<32x128xbf16>, vector<64x128xf32> -> vector<64x128xf32>
    %c0_21 = arith.constant 0 : index
    %c0_22 = arith.constant 0 : index
    %27 = vector.load %arg13[%c0_21, %c0_22] : memref<64x1xf32, #tpu.memory_space<vmem>>, vector<64x1xf32>
    %28 = vector.broadcast %27 : vector<64x1xf32> to vector<64x128xf32>
    %29 = arith.addf %26, %28 : vector<64x128xf32>
    %cst_23 = arith.constant 0.000000e+00 : f32
    %30 = vector.broadcast %cst_23 : f32 to vector<64x128xf32>
    %31 = arith.maximumf %29, %30 : vector<64x128xf32>
    %32 = arith.truncf %31 : vector<64x128xf32> to vector<64x128xbf16>
    %c0_24 = arith.constant 0 : index
    %c0_25 = arith.constant 0 : index
    %33 = vector.load %arg6[%c0_24, %c0_25] : memref<128x64xbf16, #tpu.memory_space<vmem>>, vector<128x64xbf16>
    %cst_26 = arith.constant dense<0.000000e+00> : vector<128x128xf32>
    %34 = tpu.matmul %33, %32, %cst_26 {dimension_numbers = #tpu.dot_dimension_numbers<[1], [0], [0], [1], [0, 0, 1, 1], [], []>} : vector<128x64xbf16>, vector<64x128xbf16>, vector<128x128xf32> -> vector<128x128xf32>
    %c0_27 = arith.constant 0 : index
    %c0_28 = arith.constant 0 : index
    %35 = vector.load %arg14[%c0_27, %c0_28] : memref<128x1xf32, #tpu.memory_space<vmem>>, vector<128x1xf32>
    %36 = vector.broadcast %35 : vector<128x1xf32> to vector<128x128xf32>
    %37 = arith.addf %34, %36 : vector<128x128xf32>
    %cst_29 = arith.constant 0.000000e+00 : f32
    %38 = vector.broadcast %cst_29 : f32 to vector<128x128xf32>
    %39 = arith.maximumf %37, %38 : vector<128x128xf32>
    %40 = arith.truncf %39 : vector<128x128xf32> to vector<128x128xbf16>
    %c0_30 = arith.constant 0 : index
    %c0_31 = arith.constant 0 : index
    %41 = vector.load %arg7[%c0_30, %c0_31] : memref<256x128xbf16, #tpu.memory_space<vmem>>, vector<256x128xbf16>
    %cst_32 = arith.constant dense<0.000000e+00> : vector<256x128xf32>
    %42 = tpu.matmul %41, %40, %cst_32 {dimension_numbers = #tpu.dot_dimension_numbers<[1], [0], [0], [1], [0, 0, 1, 1], [], []>} : vector<256x128xbf16>, vector<128x128xbf16>, vector<256x128xf32> -> vector<256x128xf32>
    %c0_33 = arith.constant 0 : index
    %c0_34 = arith.constant 0 : index
    %43 = vector.load %arg15[%c0_33, %c0_34] : memref<256x1xf32, #tpu.memory_space<vmem>>, vector<256x1xf32>
    %44 = vector.broadcast %43 : vector<256x1xf32> to vector<256x128xf32>
    %45 = arith.addf %42, %44 : vector<256x128xf32>
    %cst_35 = arith.constant 0.000000e+00 : f32
    %46 = vector.broadcast %cst_35 : f32 to vector<256x128xf32>
    %47 = arith.maximumf %45, %46 : vector<256x128xf32>
    %48 = arith.truncf %47 : vector<256x128xf32> to vector<256x128xbf16>
    %c0_36 = arith.constant 0 : index
    %c0_37 = arith.constant 0 : index
    %49 = vector.load %arg8[%c0_36, %c0_37] : memref<128x256xbf16, #tpu.memory_space<vmem>>, vector<128x256xbf16>
    %cst_38 = arith.constant dense<0.000000e+00> : vector<128x128xf32>
    %50 = tpu.matmul %49, %48, %cst_38 {dimension_numbers = #tpu.dot_dimension_numbers<[1], [0], [0], [1], [0, 0, 1, 1], [], []>} : vector<128x256xbf16>, vector<256x128xbf16>, vector<128x128xf32> -> vector<128x128xf32>
    %c0_39 = arith.constant 0 : index
    %c0_40 = arith.constant 0 : index
    %51 = vector.load %arg16[%c0_39, %c0_40] : memref<128x1xf32, #tpu.memory_space<vmem>>, vector<128x1xf32>
    %52 = vector.broadcast %51 : vector<128x1xf32> to vector<128x128xf32>
    %53 = arith.addf %50, %52 : vector<128x128xf32>
    %cst_41 = arith.constant 0.000000e+00 : f32
    %54 = vector.broadcast %cst_41 : f32 to vector<128x128xf32>
    %55 = arith.maximumf %53, %54 : vector<128x128xf32>
    %56 = arith.truncf %55 : vector<128x128xf32> to vector<128x128xbf16>
    %c0_42 = arith.constant 0 : index
    %c0_43 = arith.constant 0 : index
    %57 = vector.load %arg9[%c0_42, %c0_43] : memref<8x128xbf16, #tpu.memory_space<vmem>>, vector<8x128xbf16>
    %cst_44 = arith.constant dense<0.000000e+00> : vector<8x128xf32>
    %58 = tpu.matmul %57, %56, %cst_44 {dimension_numbers = #tpu.dot_dimension_numbers<[1], [0], [0], [1], [0, 0, 1, 1], [], []>} : vector<8x128xbf16>, vector<128x128xbf16>, vector<8x128xf32> -> vector<8x128xf32>
    %c0_45 = arith.constant 0 : index
    %c0_46 = arith.constant 0 : index
    %59 = vector.load %arg17[%c0_45, %c0_46] : memref<8x1xf32, #tpu.memory_space<vmem>>, vector<8x1xf32>
    %60 = vector.broadcast %59 : vector<8x1xf32> to vector<8x128xf32>
    %61 = arith.addf %58, %60 : vector<8x128xf32>
    %c0_47 = arith.constant 0 : index
    %c0_48 = arith.constant 0 : index
    %62 = vector.load %arg18[%c0_47, %c0_48] : memref<8x128xf32, #tpu.memory_space<vmem>>, vector<8x128xf32>
    tpu.vector_store %arg18[%c0_47, %c0_48], %61 {strides = array<i32>} : memref<8x128xf32, #tpu.memory_space<vmem>>, vector<8x128xf32>,
    return
  }
  func.func @transform_0(%arg0: i32) -> (i32, i32) {
    %c0_i32 = arith.constant 0 : i32
    %c0_i32_0 = arith.constant 0 : i32
    return %c0_i32, %arg0 : i32, i32
  }
  func.func @transform_1(%arg0: i32) -> (i32, i32) {
    %c0_i32 = arith.constant 0 : i32
    %c0_i32_0 = arith.constant 0 : i32
    %c0_i32_1 = arith.constant 0 : i32
    return %c0_i32, %c0_i32_0 : i32, i32
  }
  func.func @transform_2(%arg0: i32) -> (i32, i32) {
    %c0_i32 = arith.constant 0 : i32
    %c0_i32_0 = arith.constant 0 : i32
    %c0_i32_1 = arith.constant 0 : i32
    return %c0_i32, %c0_i32_0 : i32, i32
  }
  func.func @transform_3(%arg0: i32) -> (i32, i32) {
    %c0_i32 = arith.constant 0 : i32
    %c0_i32_0 = arith.constant 0 : i32
    %c0_i32_1 = arith.constant 0 : i32
    return %c0_i32, %c0_i32_0 : i32, i32
  }
  func.func @transform_4(%arg0: i32) -> (i32, i32) {
    %c0_i32 = arith.constant 0 : i32
    %c0_i32_0 = arith.constant 0 : i32
    %c0_i32_1 = arith.constant 0 : i32
    return %c0_i32, %c0_i32_0 : i32, i32
  }
  func.func @transform_5(%arg0: i32) -> (i32, i32) {
    %c0_i32 = arith.constant 0 : i32
    %c0_i32_0 = arith.constant 0 : i32
    %c0_i32_1 = arith.constant 0 : i32
    return %c0_i32, %c0_i32_0 : i32, i32
  }
  func.func @transform_6(%arg0: i32) -> (i32, i32) {
    %c0_i32 = arith.constant 0 : i32
    %c0_i32_0 = arith.constant 0 : i32
    %c0_i32_1 = arith.constant 0 : i32
    return %c0_i32, %c0_i32_0 : i32, i32
  }
  func.func @transform_7(%arg0: i32) -> (i32, i32) {
    %c0_i32 = arith.constant 0 : i32
    %c0_i32_0 = arith.constant 0 : i32
    %c0_i32_1 = arith.constant 0 : i32
    return %c0_i32, %c0_i32_0 : i32, i32
  }
  func.func @transform_8(%arg0: i32) -> (i32, i32) {
    %c0_i32 = arith.constant 0 : i32
    %c0_i32_0 = arith.constant 0 : i32
    %c0_i32_1 = arith.constant 0 : i32
    return %c0_i32, %c0_i32_0 : i32, i32
  }
  func.func @transform_9(%arg0: i32) -> (i32, i32) {
    %c0_i32 = arith.constant 0 : i32
    %c0_i32_0 = arith.constant 0 : i32
    %c0_i32_1 = arith.constant 0 : i32
    return %c0_i32, %c0_i32_0 : i32, i32
  }
  func.func @transform_10(%arg0: i32) -> (i32, i32) {
    %c0_i32 = arith.constant 0 : i32
    %c0_i32_0 = arith.constant 0 : i32
    %c0_i32_1 = arith.constant 0 : i32
    return %c0_i32, %c0_i32_0 : i32, i32
  }
  func.func @transform_11(%arg0: i32) -> (i32, i32) {
    %c0_i32 = arith.constant 0 : i32
    %c0_i32_0 = arith.constant 0 : i32
    %c0_i32_1 = arith.constant 0 : i32
    return %c0_i32, %c0_i32_0 : i32, i32
  }
  func.func @transform_12(%arg0: i32) -> (i32, i32) {
    %c0_i32 = arith.constant 0 : i32
    %c0_i32_0 = arith.constant 0 : i32
    %c0_i32_1 = arith.constant 0 : i32
    return %c0_i32, %c0_i32_0 : i32, i32
  }
  func.func @transform_13(%arg0: i32) -> (i32, i32) {
    %c0_i32 = arith.constant 0 : i32
    %c0_i32_0 = arith.constant 0 : i32
    %c0_i32_1 = arith.constant 0 : i32
    return %c0_i32, %c0_i32_0 : i32, i32
  }
  func.func @transform_14(%arg0: i32) -> (i32, i32) {
    %c0_i32 = arith.constant 0 : i32
    %c0_i32_0 = arith.constant 0 : i32
    %c0_i32_1 = arith.constant 0 : i32
    return %c0_i32, %c0_i32_0 : i32, i32
  }
  func.func @transform_15(%arg0: i32) -> (i32, i32) {
    %c0_i32 = arith.constant 0 : i32
    %c0_i32_0 = arith.constant 0 : i32
    %c0_i32_1 = arith.constant 0 : i32
    return %c0_i32, %c0_i32_0 : i32, i32
  }
  func.func @transform_16(%arg0: i32) -> (i32, i32) {
    %c0_i32 = arith.constant 0 : i32
    %c0_i32_0 = arith.constant 0 : i32
    %c0_i32_1 = arith.constant 0 : i32
    return %c0_i32, %c0_i32_0 : i32, i32
  }
  func.func @transform_17(%arg0: i32) -> (i32, i32) {
    %c0_i32 = arith.constant 0 : i32
    %c0_i32_0 = arith.constant 0 : i32
    return %c0_i32, %arg0 : i32, i32
  }
}

</mosaic_0001>

<bundles_post_ra>
// kernel: dqn_forward.1
= control target key start
LH: loop header
LB: loop body
LE: loop exit
PB: predicated region body
PF: predicated region fallthrough
CT: control target
= control target key end

     0   :  { %vm69_vm0 = vcmask 1042432   ;;  %v2011_v0 = vmov 0   ;;  %v2012_v1 = vmov 0.0   ;;  %vm2013_vm1 = vmmov 0   ;;  %s2599_s9 = inlined_call_operand.vmem [shape: f32[8,1], index: 9, kind: input, shape index: {}]   ;;  %s2600_s0 = inlined_call_operand.vmem [shape: bf16[6,128], index: 0, kind: input, shape index: {}]   ;;  %s2601_s10 = inlined_call_operand.vmem [shape: f32[16,1], index: 10, kind: input, shape index: {}]   ;;  %s2602_s1 = inlined_call_operand.vmem [shape: bf16[8,6], index: 1, kind: input, shape index: {}]   ;;  %s2603_s11 = inlined_call_operand.vmem [shape: f32[32,1], index: 11, kind: input, shape index: {}]   ;;  %s2604_s12 = inlined_call_operand.vmem [shape: f32[64,1], index: 12, kind: input, shape index: {}]   ;;  %s2605_s13 = inlined_call_operand.vmem [shape: f32[128,1], index: 13, kind: input, shape index: {}]   ;;  %s2606_s14 = inlined_call_operand.vmem [shape: f32[256,1], index: 14, kind: input, shape index: {}]   ;;  %s2607_s2 = inlined_call_operand.vmem [shape: bf16[16,8], index: 2, kind: input, shape index: {}]   ;;  %s2608_s15 = inlined_call_operand.vmem [shape: f32[128,1], index: 15, kind: input, shape index: {}]   ;;  %s2609_s16 = inlined_call_operand.vmem [shape: f32[8,1], index: 16, kind: input, shape index: {}]   ;;  %s2610_s3 = inlined_call_operand.vmem [shape: bf16[32,16], index: 3, kind: input, shape index: {}]   ;;  %s2611_s4 = inlined_call_operand.vmem [shape: bf16[64,32], index: 4, kind: input, shape index: {}]   ;;  %s2612_s5 = inlined_call_operand.vmem [shape: bf16[128,64], index: 5, kind: input, shape index: {}]   ;;  %s2613_s6 = inlined_call_operand.vmem [shape: bf16[256,128], index: 6, kind: input, shape index: {}]   ;;  %s2614_s7 = inlined_call_operand.vmem [shape: bf16[128,256], index: 7, kind: input, shape index: {}]   ;;  %s2615_s8 = inlined_call_operand.vmem [shape: bf16[8,128], index: 8, kind: input, shape index: {}]   ;;  %s2616_s17 = inlined_call_operand.vmem [shape: f32[8,128], index: 17, kind: output, shape index: {}]  }
   0x1   :  { %2617 = sst [smem:[#allocation2_spill]] %s2599_s9  ;;  %1954 = vset.pattern.permute.xlu0 %v2011_v0  ;;  %1829 = vmatprep.subr.bf16.mxu0 %v2012_v1  ;;  %v117_v5 = vld [vmem:[%s2601_s10] sm:$0xff]  ;;  %vm65_vm2 = vcmask 48128   ;;  %v191_v7 = vld [vmem:[%s2603_s11 + $0x8] sm:$0xff]  ;;  %v193_v8 = vld [vmem:[%s2603_s11 + $0x18] sm:$0xff]  ;;  %vm138_vm3 = vcmask 1043456  }
   0x2   :  { %2618 = sst [smem:[#allocation3_spill]] %s2600_s0  ;;  %s2619_s26 = sld [smem:[#allocation2_spill]]  ;;  %1831 = vmatprep.mubr.msk.bf16.mxu0 %vm2013_vm1, %v2012_v1  ;;  %v58_v6 = vld [vmem:[%s2602_s1] sm:$0xf]  ;;  %1955 = vset.pattern.permute.xlu1 %v2011_v0  ;;  %v295_v9 = vld [vmem:[%s2604_s12 + $0x8] sm:$0xff]  ;;  %v297_v10 = vld [vmem:[%s2604_s12 + $0x18] sm:$0xff] }
   0x3   :  { %s2620_s29 = sld [smem:[#allocation3_spill]]  ;;  %1835 = vmatprep.subr.bf16.mxu1 %v2012_v1  ;;  %1837 = vmatprep.mubr.msk.bf16.mxu1 %vm2013_vm1, %v2012_v1  ;;  %v299_v11 = vld [vmem:[%s2604_s12 + $0x28] sm:$0xff]  ;;  %v301_v12 = vld [vmem:[%s2604_s12 + $0x38] sm:$0xff]  ;;  %v190_v15 = vld [vmem:[%s2603_s11] sm:$0xff]  ;;  %vm134_vm4 = vcmask 64512   ;;  %vm224_vm5 = vcmask 130048  }
   0x4   :  { %v118_v13 = vld [vmem:[%s2601_s10 + $0x8] sm:$0xff]  ;;  %v471_v16 = vld [vmem:[%s2605_s13 + $0x18] sm:$0xff]  ;;  %v192_v17 = vld [vmem:[%s2603_s11 + $0x10] sm:$0xff]  ;;  %vm362_vm6 = vcmask 261120   ;;  %vm604_vm7 = vcmask 523264  }
   0x5   :  { %126 = vperm.xlu1 %1955, %v118_v13   ;;  %v469_v14 = vld [vmem:[%s2605_s13 + $0x8] sm:$0xff]  ;;  %v294_v19 = vld [vmem:[%s2604_s12] sm:$0xff]  ;;  %v475_v20 = vld [vmem:[%s2605_s13 + $0x38] sm:$0xff] }
   0x6   :  { %v473_v18 = vld [vmem:[%s2605_s13 + $0x28] sm:$0xff]  ;;  %v296_v21 = vld [vmem:[%s2604_s12 + $0x10] sm:$0xff]  ;;  %v298_v23 = vld [vmem:[%s2604_s12 + $0x20] sm:$0xff] }
   0x7   :  { %v477_v22 = vld [vmem:[%s2605_s13 + $0x48] sm:$0xff]  ;;  %v479_v24 = vld [vmem:[%s2605_s13 + $0x58] sm:$0xff]  ;;  %v300_v25 = vld [vmem:[%s2604_s12 + $0x30] sm:$0xff] }
   0x8   :  { %v59_v2 = vld [vmem:[%s2619_s26] sm:$0xff]  ;;  %v481_v26 = vld [vmem:[%s2605_s13 + $0x68] sm:$0xff]  ;;  %v483_v28 = vld [vmem:[%s2605_s13 + $0x78] sm:$0xff] }
   0x9   :  { %v57_v3 = vld [vmem:[%s2620_s29] sm:$0x7]  ;;  %62 = vperm.xlu0 %1954, %v59_v2   ;;  %196 = vperm.xlu1 %1955, %v190_v15   ;;  %v470_v29 = vld [vmem:[%s2605_s13 + $0x10] sm:$0xff]  ;;  %v799_v30 = vld [vmem:[%s2606_s14 + $0x88] sm:$0xff] }
   0xa   :  { %v71_v4 = vsel %vm69_vm0, %v57_v3, 0  ;;  %v468_v27 = vld [vmem:[%s2605_s13] sm:$0xff]  ;;  %v783_v32 = vld [vmem:[%s2606_s14 + $0x8] sm:$0xff]  ;;  %v474_v33 = vld [vmem:[%s2605_s13 + $0x30] sm:$0xff] }
   0xb   :  { %1830 = vmatpush3.bf16.msra.mxu0 %v71_v4  ;;  %v472_v31 = vld [vmem:[%s2605_s13 + $0x20] sm:$0xff]  ;;  %v801_v34 = vld [vmem:[%s2606_s14 + $0x98] sm:$0xff]  ;;  %v478_v37 = vld [vmem:[%s2605_s13 + $0x50] sm:$0xff] }
   0xc   :  { %v476_v35 = vld [vmem:[%s2605_s13 + $0x40] sm:$0xff]  ;;  %v785_v36 = vld [vmem:[%s2606_s14 + $0x18] sm:$0xff]  ;;  %v803_v38 = vld [vmem:[%s2606_s14 + $0xa8] sm:$0xff] }
   0xd   :  { %121 = vperm.xlu0 %1954, %v117_v5   ;;  %206 = vperm.xlu1 %1955, %v192_v17   ;;  %v480_v39 = vld [vmem:[%s2605_s13 + $0x60] sm:$0xff]  ;;  %v787_v40 = vld [vmem:[%s2606_s14 + $0x28] sm:$0xff]  ;;  %v482_v41 = vld [vmem:[%s2605_s13 + $0x70] sm:$0xff] }
   0xe   :  { %1832 = vmatmul.mubr.msk.bf16.vlgmr.msra.gmra.mrb[0].mxu0 %vm65_vm2, %v58_v6  ;;  %v805_v42 = vld [vmem:[%s2606_s14 + $0xb8] sm:$0xff]  ;;  %v798_v43 = vld [vmem:[%s2606_s14 + $0x80] sm:$0xff]  ;;  %v807_v46 = vld [vmem:[%s2606_s14 + $0xc8] sm:$0xff] }
   0xf   :  { %v789_v44 = vld [vmem:[%s2606_s14 + $0x38] sm:$0xff]  ;;  %v782_v45 = vld [vmem:[%s2606_s14] sm:$0xff]  ;;  %v800_v47 = vld [vmem:[%s2606_s14 + $0x90] sm:$0xff] }
  0x10   :  { %v791_v48 = vld [vmem:[%s2606_s14 + $0x48] sm:$0xff]  ;;  %v784_v49 = vld [vmem:[%s2606_s14 + $0x10] sm:$0xff]  ;;  %v809_v50 = vld [vmem:[%s2606_s14 + $0xd8] sm:$0xff] }
  0x11   :  { %201 = vperm.xlu0 %1954, %v191_v7   ;;  %304 = vperm.xlu1 %1955, %v294_v19   ;;  %v802_v51 = vld [vmem:[%s2606_s14 + $0xa0] sm:$0xff]  ;;  %v793_v52 = vld [vmem:[%s2606_s14 + $0x58] sm:$0xff]  ;;  %v811_v54 = vld [vmem:[%s2606_s14 + $0xe8] sm:$0xff] }
  0x12   :  { %v786_v53 = vld [vmem:[%s2606_s14 + $0x20] sm:$0xff]  ;;  %v804_v55 = vld [vmem:[%s2606_s14 + $0xb0] sm:$0xff]  ;;  %v795_v56 = vld [vmem:[%s2606_s14 + $0x68] sm:$0xff] }
  0x13   :  { %v788_v57 = vld [vmem:[%s2606_s14 + $0x30] sm:$0xff]  ;;  %v813_v58 = vld [vmem:[%s2606_s14 + $0xf8] sm:$0xff]  ;;  %v806_v59 = vld [vmem:[%s2606_s14 + $0xc0] sm:$0xff] }
  0x14   :  { %v797_v60 = vld [vmem:[%s2606_s14 + $0x78] sm:$0xff]  ;;  %v790_v61 = vld [vmem:[%s2606_s14 + $0x40] sm:$0xff]  ;;  %v1296_v62 = vld [vmem:[%s2608_s15 + $0x8] sm:$0xff] }
  0x15   :  { %211 = vperm.xlu0 %1954, %v193_v8   ;;  %314 = vperm.xlu1 %1955, %v296_v21   ;;  %v808_v63 = vld [vmem:[%s2606_s14 + $0xd0] sm:$0xff]  ;;  %v1298_v0 = vld [vmem:[%s2608_s15 + $0x18] sm:$0xff]  ;;  %v1300_v3 = vld [vmem:[%s2608_s15 + $0x28] sm:$0xff] }
  0x16   :  { %v792_v2 = vld [vmem:[%s2606_s14 + $0x50] sm:$0xff]  ;;  %v810_v4 = vld [vmem:[%s2606_s14 + $0xe0] sm:$0xff]  ;;  %v1302_v5 = vld [vmem:[%s2608_s15 + $0x38] sm:$0xff] }
  0x17   :  { %v794_v6 = vld [vmem:[%s2606_s14 + $0x60] sm:$0xff]  ;;  %v1304_v7 = vld [vmem:[%s2608_s15 + $0x48] sm:$0xff]  ;;  %v812_v8 = vld [vmem:[%s2606_s14 + $0xf0] sm:$0xff] }
  0x18   :  { %v1310_v13 = vld [vmem:[%s2608_s15 + $0x78] sm:$0xff]  ;;  %v1299_v15 = vld [vmem:[%s2608_s15 + $0x20] sm:$0xff] }
  0x19   :  { %309 = vperm.xlu0 %1954, %v295_v9   ;;  %324 = vperm.xlu1 %1955, %v298_v23   ;;  %v1306_v9 = vld [vmem:[%s2608_s15 + $0x58] sm:$0xff]  ;;  %v1303_v17 = vld [vmem:[%s2608_s15 + $0x40] sm:$0xff] }
  0x1a   :  { %v1307_v19 = vld [vmem:[%s2608_s15 + $0x60] sm:$0xff] }
  0x1b   :  { %v1593_v21 = vld [vmem:[%s2609_s16] sm:$0xff] }
  0x1d   :  { %319 = vperm.xlu0 %1954, %v297_v10   ;;  %334 = vperm.xlu1 %1955, %v300_v25   ;;  %v796_v10 = vld [vmem:[%s2606_s14 + $0x70] sm:$0xff] }
  0x21   :  { %329 = vperm.xlu0 %1954, %v299_v11   ;;  %486 = vperm.xlu1 %1955, %v468_v27   ;;  %v1308_v11 = vld [vmem:[%s2608_s15 + $0x68] sm:$0xff] }
  0x25   :  { %339 = vperm.xlu0 %1954, %v301_v12   ;;  %496 = vperm.xlu1 %1955, %v470_v29   ;;  %v1295_v12 = vld [vmem:[%s2608_s15] sm:$0xff] }
  0x29   :  { %491 = vperm.xlu0 %1954, %v469_v14   ;;  %506 = vperm.xlu1 %1955, %v472_v31   ;;  %v1297_v14 = vld [vmem:[%s2608_s15 + $0x10] sm:$0xff]  ;;  %v1956_v31 = vld [vmem:[%s2607_s2] sm:$0xff]  }
  0x2d   :  { %501 = vperm.xlu0 %1954, %v471_v16   ;;  %516 = vperm.xlu1 %1955, %v474_v33   ;;  %v1301_v16 = vld [vmem:[%s2608_s15 + $0x30] sm:$0xff] }
  0x31   :  { %511 = vperm.xlu0 %1954, %v473_v18   ;;  %526 = vperm.xlu1 %1955, %v476_v35   ;;  %v1305_v18 = vld [vmem:[%s2608_s15 + $0x50] sm:$0xff] }
  0x35   :  { %521 = vperm.xlu0 %1954, %v475_v20   ;;  %536 = vperm.xlu1 %1955, %v478_v37   ;;  %v1309_v20 = vld [vmem:[%s2608_s15 + $0x70] sm:$0xff] }
  0x39   :  { %531 = vperm.xlu0 %1954, %v477_v22   ;;  %546 = vperm.xlu1 %1955, %v480_v39  }
  0x3d   :  { %541 = vperm.xlu0 %1954, %v479_v24   ;;  %556 = vperm.xlu1 %1955, %v482_v41  }
  0x41   :  { %551 = vperm.xlu0 %1954, %v481_v26   ;;  %896 = vperm.xlu1 %1955, %v798_v43  }
  0x45   :  { %561 = vperm.xlu0 %1954, %v483_v28   ;;  %816 = vperm.xlu1 %1955, %v782_v45   ;;  %v1959_v45 = vld [vmem:[%s2611_s4] sm:$0xff]  }
  0x49   :  { %901 = vperm.xlu0 %1954, %v799_v30   ;;  %906 = vperm.xlu1 %1955, %v800_v47  }
  0x4d   :  { %821 = vperm.xlu0 %1954, %v783_v32   ;;  %826 = vperm.xlu1 %1955, %v784_v49   ;;  %v1957_v32 = vld [vmem:[%s2610_s3] sm:$0xff]  }
  0x4e   :  { %1843 = vmatprep.mubr.msk.bf16.mxu0 %vm224_vm5, %v1957_v32 }
  0x51   :  { %911 = vperm.xlu0 %1954, %v801_v34   ;;  %916 = vperm.xlu1 %1955, %v802_v51  }
  0x55   :  { %831 = vperm.xlu0 %1954, %v785_v36   ;;  %836 = vperm.xlu1 %1955, %v786_v53  }
  0x59   :  { %921 = vperm.xlu0 %1954, %v803_v38   ;;  %926 = vperm.xlu1 %1955, %v804_v55  }
  0x5d   :  { %841 = vperm.xlu0 %1954, %v787_v40   ;;  %846 = vperm.xlu1 %1955, %v788_v57  }
  0x61   :  { %931 = vperm.xlu0 %1954, %v805_v42   ;;  %936 = vperm.xlu1 %1955, %v806_v59  }
  0x65   :  { %851 = vperm.xlu0 %1954, %v789_v44   ;;  %856 = vperm.xlu1 %1955, %v790_v61   ;;  %v1958_v44 = vld [vmem:[%s2610_s3 + $0x8] sm:$0xff]  }
  0x69   :  { %941 = vperm.xlu0 %1954, %v807_v46   ;;  %946 = vperm.xlu1 %1955, %v808_v63  }
  0x6d   :  { %861 = vperm.xlu0 %1954, %v791_v48   ;;  %866 = vperm.xlu1 %1955, %v792_v2   ;;  %v1961_v2 = vld [vmem:[%s2611_s4 + $0x10] sm:$0xff]  }
  0x71   :  { %951 = vperm.xlu0 %1954, %v809_v50   ;;  %956 = vperm.xlu1 %1955, %v810_v4   ;;  %v1963_v4 = vld [vmem:[%s2612_s5] sm:$0xff]  }
  0x75   :  { %871 = vperm.xlu0 %1954, %v793_v52   ;;  %876 = vperm.xlu1 %1955, %v794_v6  }
  0x79   :  { %961 = vperm.xlu0 %1954, %v811_v54   ;;  %966 = vperm.xlu1 %1955, %v812_v8  }
  0x7d   :  { %881 = vperm.xlu0 %1954, %v795_v56   ;;  %886 = vperm.xlu1 %1955, %v796_v10  }
  0x81   :  { %971 = vperm.xlu0 %1954, %v813_v58   ;;  %1313 = vperm.xlu1 %1955, %v1295_v12  }
  0x84   :  { %v127_v37 = vpop.permute.xlu1 %126 }
  0x85   :  { %891 = vperm.xlu0 %1954, %v797_v60   ;;  %1323 = vperm.xlu1 %1955, %v1297_v14  }
  0x88   :  { %v63_v22 = vpop.permute.xlu0 %62  ;;  %v197_v46 = vpop.permute.xlu1 %196 }
  0x89   :  { %1318 = vperm.xlu0 %1954, %v1296_v62   ;;  %1333 = vperm.xlu1 %1955, %v1299_v15  }
  0x8c   :  { %v122_v33 = vpop.permute.xlu0 %121  ;;  %v207_v48 = vpop.permute.xlu1 %206 }
  0x8d   :  { %1328 = vperm.xlu0 %1954, %v1298_v0   ;;  %1343 = vperm.xlu1 %1955, %v1301_v16   ;;  %v1960_v0 = vld [vmem:[%s2611_s4 + $0x8] sm:$0xff]  }
  0x90   :  { %v202_v47 = vpop.permute.xlu0 %201 }
  0x91   :  { %1338 = vperm.xlu0 %1954, %v1300_v3   ;;  %1353 = vperm.xlu1 %1955, %v1303_v17   ;;  %v1962_v3 = vld [vmem:[%s2611_s4 + $0x18] sm:$0xff]  }
  0x94   :  { %v212_v52 = vpop.permute.xlu0 %211 }
  0x95   :  { %1348 = vperm.xlu0 %1954, %v1302_v5   ;;  %1363 = vperm.xlu1 %1955, %v1305_v18   ;;  %v305_v5 = vpop.permute.xlu1 %304 }
  0x98   :  { %v310_v6 = vpop.permute.xlu0 %309 }
  0x99   :  { %1358 = vperm.xlu0 %1954, %v1304_v7   ;;  %1373 = vperm.xlu1 %1955, %v1307_v19   ;;  %v315_v7 = vpop.permute.xlu1 %314 }
  0x9c   :  { %v320_v8 = vpop.permute.xlu0 %319 }
  0x9d   :  { %1368 = vperm.xlu0 %1954, %v1306_v9   ;;  %1383 = vperm.xlu1 %1955, %v1309_v20   ;;  %v325_v12 = vpop.permute.xlu1 %324 }
  0xa0   :  { %v330_v17 = vpop.permute.xlu0 %329 }
  0xa1   :  { %1378 = vperm.xlu0 %1954, %v1308_v11   ;;  %1596 = vperm.xlu1 %1955, %v1593_v21  }
  0xa5   :  { %1388 = vperm.xlu0 %1954, %v1310_v13  }
  0xe1   :  { %v107_v23 = vpop.f32.mrb[0].mxu0 }
  0xe2   :  { %v108_v24 = vadd.f32 %v107_v23, %v63_v22  ;;  %v1833_v25 = vpop.f32.mrb[1].mxu0 }
  0xe3   :  { %v110_v26 = vpop.f32.mrb[2].mxu0 }
  0xe4   :  { %v113_v27 = vmax.f32 %v108_v24, 0.0  ;;  %v1834_v28 = vpop.f32.mrb[3].mxu0  ;;  %v335_v24 = vpop.permute.xlu1 %334 }
  0xe6   :  { %v114_v29 = vpack.c.bf16 %v113_v27, %v113_v27 }
  0xe8   :  { %v140_v30 = vsel %vm138_vm3, %v114_v29, 0  ;;  %v340_v29 = vpop.permute.xlu0 %339 }
  0xe9   :  { %1836 = vmatpush3.bf16.msra.mxu1 %v140_v30 }
  0xec   :  { %1838 = vmatmul.mubr.msk.bf16.vlgmr.msra.gmra.mrb[0].mxu1 %vm134_vm4, %v1956_v31 }
  0xed   :  { %1851 = vmatprep.mubr.msk.bf16.mxu1 %vm362_vm6, %v1959_v45  ;;  %v1968_v45 = vld [vmem:[%s2612_s5 + $0x28] sm:$0xff]  }
 0x1bf   :  { %v176_v34 = vpop.f32.mrb[0].mxu1 }
 0x1c0   :  { %v177_v35 = vadd.f32 %v176_v34, %v122_v33  ;;  %v1839_v36 = vpop.f32.mrb[1].mxu1 }
 0x1c1   :  { %v179_v38 = vpop.f32.mrb[2].mxu1 }
 0x1c2   :  { %v180_v39 = vadd.f32 %v179_v38, %v127_v37  ;;  %v1840_v40 = vpop.f32.mrb[3].mxu1  ;;  %v183_v41 = vmax.f32 %v177_v35, 0.0 }
 0x1c4   :  { %v184_v42 = vmax.f32 %v180_v39, 0.0 }
 0x1c6   :  { %v185_v43 = vpack.c.bf16 %v184_v42, %v183_v41  ;;  %v1964_v41 = vld [vmem:[%s2612_s5 + $0x8] sm:$0xff]   ;;  %v1965_v42 = vld [vmem:[%s2612_s5 + $0x10] sm:$0xff]  }
 0x1c8   :  { %1841 = vmatprep.subr.bf16.mxu0 %v185_v43 }
 0x1c9   :  { %1842 = vmatpush3.bf16.msra.mxu0 %v185_v43  ;;  %v1966_v43 = vld [vmem:[%s2612_s5 + $0x18] sm:$0xff]  }
 0x1cc   :  { %1844 = vmatmul.mubr.msk.bf16.vlgmr.msra.gmra.mrb[4].mxu0 %vm224_vm5, %v1958_v44  ;;  %v1967_v44 = vld [vmem:[%s2612_s5 + $0x20] sm:$0xff]  }
 0x1cd   :  { %1867 = vmatprep.mubr.msk.bf16.mxu0 %vm604_vm7, %v1963_v4 }
 0x29f   :  { %v1845_v49 = vpop.f32.mrb[4].mxu0 }
 0x2a0   :  { %v274_v50 = vadd.f32 %v1845_v49, %v207_v48  ;;  %v265_v51 = vpop.f32.mrb[5].mxu0  ;;  %v1971_v48 = vld [vmem:[%s2613_s6] sm:$0xff]   ;;  %v487_v49 = vpop.permute.xlu1 %486 }
 0x2a1   :  { %v266_v53 = vadd.f32 %v265_v51, %v197_v46  ;;  %v1846_v54 = vpop.f32.mrb[6].mxu0  ;;  %v1969_v46 = vld [vmem:[%s2612_s5 + $0x30] sm:$0xff]  }
 0x2a2   :  { %v277_v55 = vadd.f32 %v1846_v54, %v212_v52  ;;  %v268_v56 = vpop.f32.mrb[7].mxu0  ;;  %v282_v58 = vmax.f32 %v274_v50, 0.0  ;;  %v492_v50 = vpop.permute.xlu0 %491 }
 0x2a3   :  { %v269_v57 = vadd.f32 %v268_v56, %v202_v47  ;;  %v280_v60 = vmax.f32 %v266_v53, 0.0  ;;  %v1970_v47 = vld [vmem:[%s2612_s5 + $0x38] sm:$0xff]  }
 0x2a4   :  { %v283_v59 = vmax.f32 %v277_v55, 0.0  ;;  %v497_v51 = vpop.permute.xlu1 %496 }
 0x2a5   :  { %v281_v61 = vmax.f32 %v269_v57, 0.0 }
 0x2a6   :  { %v285_v62 = vpack.c.bf16 %v283_v59, %v282_v58  ;;  %v502_v52 = vpop.permute.xlu0 %501 }
 0x2a7   :  { %v284_v63 = vpack.c.bf16 %v281_v61, %v280_v60 }
 0x2a8   :  { %v507_v53 = vpop.permute.xlu1 %506 }
 0x2a9   :  { %1847 = vmatprep.subr.bf16.mxu1 %v284_v63 }
 0x2aa   :  { %1848 = vmatpush3.bf16.msra.mxu1 %v284_v63  ;;  %v512_v54 = vpop.permute.xlu0 %511 }
 0x2ab   :  { %1849 = vmatprep.subr.bf16.mxu1 %v285_v62 }
 0x2ac   :  { %v517_v55 = vpop.permute.xlu1 %516 }
 0x2ae   :  { %1850 = vmatpush3.bf16.msra.mxu1 %v285_v62  ;;  %v522_v59 = vpop.permute.xlu0 %521 }
 0x2b0   :  { %v527_v4 = vpop.permute.xlu1 %526 }
 0x2b1   :  { %1852 = vmatmul.mubr.msk.bf16.vlgmr.msra.gmra.mrb[4].mxu1 %vm362_vm6, %v1960_v0 }
 0x2b2   :  { %1855 = vmatprep.mubr.msk.bf16.mxu1 %vm362_vm6, %v1961_v2 }
 0x2b9   :  { %1856 = vmatmul.mubr.msk.bf16.gmra.mrb[8].mxu1 %vm362_vm6, %v1962_v3 }
 0x2ba   :  { %1899 = vmatprep.mubr.bf16.mxu1 %v1971_v48 }
 0x384   :  { %v1853_v9 = vpop.f32.mrb[4].mxu1 }
 0x385   :  { %v418_v10 = vadd.f32 %v1853_v9, %v315_v7  ;;  %v409_v11 = vpop.f32.mrb[5].mxu1 }
 0x386   :  { %v410_v13 = vadd.f32 %v409_v11, %v305_v5  ;;  %v1854_v14 = vpop.f32.mrb[6].mxu1 }
 0x387   :  { %v421_v15 = vadd.f32 %v1854_v14, %v320_v8  ;;  %v412_v16 = vpop.f32.mrb[7].mxu1  ;;  %v442_v19 = vmax.f32 %v418_v10, 0.0  ;;  %v532_v8 = vpop.permute.xlu0 %531 }
 0x388   :  { %v413_v18 = vadd.f32 %v412_v16, %v310_v6  ;;  %v440_v21 = vmax.f32 %v410_v13, 0.0 }
 0x389   :  { %v443_v20 = vmax.f32 %v421_v15, 0.0 }
 0x38a   :  { %v441_v22 = vmax.f32 %v413_v18, 0.0 }
 0x38b   :  { %v449_v23 = vpack.c.bf16 %v443_v20, %v442_v19 }
 0x38c   :  { %v448_v25 = vpack.c.bf16 %v441_v22, %v440_v21  ;;  %v1857_v26 = vpop.f32.mrb[8].mxu1  ;;  %v542_v21 = vpop.permute.xlu0 %541 }
 0x38d   :  { %v434_v27 = vadd.f32 %v1857_v26, %v335_v24  ;;  %v425_v28 = vpop.f32.mrb[9].mxu1 }
 0x38e   :  { %v426_v30 = vadd.f32 %v425_v28, %v325_v12  ;;  %v1858_v31 = vpop.f32.mrb[10].mxu1  ;;  %1859 = vmatprep.subr.bf16.mxu0 %v448_v25 }
 0x38f   :  { %v437_v32 = vadd.f32 %v1858_v31, %v340_v29  ;;  %v428_v33 = vpop.f32.mrb[11].mxu1  ;;  %1860 = vmatpush3.bf16.msra.mxu0 %v448_v25  ;;  %v446_v35 = vmax.f32 %v434_v27, 0.0 }
 0x390   :  { %v429_v34 = vadd.f32 %v428_v33, %v330_v17  ;;  %1861 = vmatprep.subr.bf16.mxu0 %v449_v23  ;;  %v444_v37 = vmax.f32 %v426_v30, 0.0  ;;  %v537_v17 = vpop.permute.xlu1 %536 }
 0x391   :  { %v447_v36 = vmax.f32 %v437_v32, 0.0 }
 0x392   :  { %v445_v38 = vmax.f32 %v429_v34, 0.0  ;;  %v552_v34 = vpop.permute.xlu0 %551 }
 0x393   :  { %v451_v39 = vpack.c.bf16 %v447_v36, %v446_v35  ;;  %1862 = vmatpush3.bf16.msra.mxu0 %v449_v23 }
 0x394   :  { %v450_v40 = vpack.c.bf16 %v445_v38, %v444_v37  ;;  %v547_v29 = vpop.permute.xlu1 %546 }
 0x396   :  { %1863 = vmatprep.subr.bf16.mxu0 %v450_v40 }
 0x397   :  { %1864 = vmatpush3.bf16.msra.mxu0 %v450_v40 }
 0x398   :  { %1865 = vmatprep.subr.bf16.mxu0 %v451_v39 }
 0x39b   :  { %1866 = vmatpush3.bf16.msra.mxu0 %v451_v39 }
 0x39e   :  { %1868 = vmatmul.mubr.msk.bf16.vlgmr.msra.gmra.mrb[8].mxu0 %vm604_vm7, %v1964_v41  ;;  %v557_v41 = vpop.permute.xlu1 %556 }
 0x39f   :  { %1871 = vmatprep.mubr.msk.bf16.mxu0 %vm604_vm7, %v1965_v42 }
 0x3a6   :  { %1872 = vmatmul.mubr.msk.bf16.gmra.mrb[12].mxu0 %vm604_vm7, %v1966_v43 }
 0x3a7   :  { %1875 = vmatprep.mubr.msk.bf16.mxu0 %vm604_vm7, %v1967_v44 }
 0x3ae   :  { %1876 = vmatmul.mubr.msk.bf16.gmra.mrb[16].mxu0 %vm604_vm7, %v1968_v45 }
 0x3af   :  { %1879 = vmatprep.mubr.msk.bf16.mxu0 %vm604_vm7, %v1969_v46  ;;  %v562_v46 = vpop.permute.xlu0 %561 }
 0x3b6   :  { %1880 = vmatmul.mubr.msk.bf16.gmra.mrb[20].mxu0 %vm604_vm7, %v1970_v47 }
 0x471   :  { %v1869_v56 = vpop.f32.mrb[8].mxu0 }
 0x472   :  { %v672_v57 = vadd.f32 %v1869_v56, %v497_v51  ;;  %v663_v58 = vpop.f32.mrb[9].mxu0 }
 0x473   :  { %v664_v60 = vadd.f32 %v663_v58, %v487_v49  ;;  %v1870_v61 = vpop.f32.mrb[10].mxu0  ;;  %v1972_v58 = vld [vmem:[%s2613_s6 + $0x8] sm:$0xff]  }
 0x474   :  { %v675_v62 = vadd.f32 %v1870_v61, %v502_v52  ;;  %v666_v63 = vpop.f32.mrb[11].mxu0  ;;  %v728_v2 = vmax.f32 %v672_v57, 0.0  ;;  %v1975_v61 = vld [vmem:[%s2613_s6 + $0x20] sm:$0xff]  }
 0x475   :  { %v667_v0 = vadd.f32 %v666_v63, %v492_v50  ;;  %v726_v5 = vmax.f32 %v664_v60, 0.0  ;;  %v1974_v60 = vld [vmem:[%s2613_s6 + $0x18] sm:$0xff]   ;;  %v1977_v63 = vld [vmem:[%s2613_s6 + $0x30] sm:$0xff]  }
 0x476   :  { %v729_v3 = vmax.f32 %v675_v62, 0.0  ;;  %v1976_v62 = vld [vmem:[%s2613_s6 + $0x28] sm:$0xff]  }
 0x477   :  { %v727_v6 = vmax.f32 %v667_v0, 0.0  ;;  %v1978_v0 = vld [vmem:[%s2613_s6 + $0x38] sm:$0xff]  }
 0x478   :  { %v743_v7 = vpack.c.bf16 %v729_v3, %v728_v2  ;;  %v1979_v2 = vld [vmem:[%s2613_s6 + $0x40] sm:$0xff]   ;;  %v1980_v3 = vld [vmem:[%s2613_s6 + $0x48] sm:$0xff]  }
 0x479   :  { %v742_v9 = vpack.c.bf16 %v727_v6, %v726_v5  ;;  %v1873_v10 = vpop.f32.mrb[12].mxu0  ;;  %v1982_v5 = vld [vmem:[%s2613_s6 + $0x58] sm:$0xff]   ;;  %v1983_v6 = vld [vmem:[%s2613_s6 + $0x60] sm:$0xff]  }
 0x47a   :  { %v688_v11 = vadd.f32 %v1873_v10, %v517_v55  ;;  %v679_v12 = vpop.f32.mrb[13].mxu0  ;;  %v2466_v10 = vpop.permute.xlu1 %896 }
 0x47b   :  { %v680_v13 = vadd.f32 %v679_v12, %v507_v53  ;;  %v1874_v14 = vpop.f32.mrb[14].mxu0  ;;  %1883 = vmatprep.subr.bf16.mxu1 %v742_v9 }
 0x47c   :  { %v691_v15 = vadd.f32 %v1874_v14, %v522_v59  ;;  %v682_v16 = vpop.f32.mrb[15].mxu0  ;;  %1884 = vmatpush3.bf16.msra.mxu1 %v742_v9  ;;  %v732_v19 = vmax.f32 %v688_v11, 0.0  ;;  %v1973_v59 = vld [vmem:[%s2613_s6 + $0x10] sm:$0xff]   ;;  %v1986_v9 = vld [vmem:[%s2613_s6 + $0x78] sm:$0xff]   ;;  %v2468_v11 = vpop.permute.xlu0 %901  ;;  %v1989_v14 = vld [vmem:[%s2614_s7 + $0x4] ss:$8 sps:$4 sm:$0xff]  }
 0x47d   :  { %v683_v18 = vadd.f32 %v682_v16, %v512_v54  ;;  %1885 = vmatprep.subr.bf16.mxu1 %v743_v7  ;;  %v730_v22 = vmax.f32 %v680_v13, 0.0  ;;  %1503 = vmatprep.mubr.bf16.mxu0 %v1989_v14 }
 0x47e   :  { %v733_v20 = vmax.f32 %v691_v15, 0.0  ;;  %v817_v12 = vpop.permute.xlu1 %816 }
 0x47f   :  { %v731_v23 = vmax.f32 %v683_v18, 0.0 }
 0x480   :  { %v745_v24 = vpack.c.bf16 %v733_v20, %v732_v19  ;;  %1886 = vmatpush3.bf16.msra.mxu1 %v743_v7  ;;  %v1984_v7 = vld [vmem:[%s2613_s6 + $0x68] sm:$0xff]   ;;  %v822_v13 = vpop.permute.xlu0 %821 }
 0x481   :  { %v744_v25 = vpack.c.bf16 %v731_v23, %v730_v22  ;;  %v1877_v26 = vpop.f32.mrb[16].mxu0 }
 0x482   :  { %v704_v27 = vadd.f32 %v1877_v26, %v537_v17  ;;  %v695_v28 = vpop.f32.mrb[17].mxu0  ;;  %v2473_v15 = vpop.permute.xlu1 %906 }
 0x483   :  { %v696_v30 = vadd.f32 %v695_v28, %v527_v4  ;;  %v1878_v31 = vpop.f32.mrb[18].mxu0  ;;  %1887 = vmatprep.subr.bf16.mxu1 %v744_v25  ;;  %v1981_v4 = vld [vmem:[%s2613_s6 + $0x50] sm:$0xff]  }
 0x484   :  { %v707_v32 = vadd.f32 %v1878_v31, %v542_v21  ;;  %v698_v33 = vpop.f32.mrb[19].mxu0  ;;  %1888 = vmatpush3.bf16.msra.mxu1 %v744_v25  ;;  %v736_v36 = vmax.f32 %v704_v27, 0.0  ;;  %v2475_v16 = vpop.permute.xlu0 %911 }
 0x485   :  { %v699_v35 = vadd.f32 %v698_v33, %v532_v8  ;;  %1889 = vmatprep.subr.bf16.mxu1 %v745_v24  ;;  %v734_v38 = vmax.f32 %v696_v30, 0.0  ;;  %v1985_v8 = vld [vmem:[%s2613_s6 + $0x70] sm:$0xff]  }
 0x486   :  { %v737_v37 = vmax.f32 %v707_v32, 0.0  ;;  %v827_v17 = vpop.permute.xlu1 %826 }
 0x487   :  { %v735_v39 = vmax.f32 %v699_v35, 0.0 }
 0x488   :  { %v747_v40 = vpack.c.bf16 %v737_v37, %v736_v36  ;;  %1890 = vmatpush3.bf16.msra.mxu1 %v745_v24  ;;  %v832_v18 = vpop.permute.xlu0 %831 }
 0x489   :  { %v746_v42 = vpack.c.bf16 %v735_v39, %v734_v38  ;;  %v1881_v43 = vpop.f32.mrb[20].mxu0 }
 0x48a   :  { %v720_v44 = vadd.f32 %v1881_v43, %v557_v41  ;;  %v711_v45 = vpop.f32.mrb[21].mxu0  ;;  %v2477_v19 = vpop.permute.xlu1 %916 }
 0x48b   :  { %v712_v47 = vadd.f32 %v711_v45, %v547_v29  ;;  %v1882_v48 = vpop.f32.mrb[22].mxu0  ;;  %1891 = vmatprep.subr.bf16.mxu1 %v746_v42 }
 0x48c   :  { %v723_v49 = vadd.f32 %v1882_v48, %v562_v46  ;;  %v714_v50 = vpop.f32.mrb[23].mxu0  ;;  %1892 = vmatpush3.bf16.msra.mxu1 %v746_v42  ;;  %v740_v52 = vmax.f32 %v720_v44, 0.0  ;;  %v2479_v20 = vpop.permute.xlu0 %921 }
 0x48d   :  { %v715_v51 = vadd.f32 %v714_v50, %v552_v34  ;;  %1893 = vmatprep.subr.bf16.mxu1 %v747_v40  ;;  %v738_v54 = vmax.f32 %v712_v47, 0.0 }
 0x48e   :  { %v741_v53 = vmax.f32 %v723_v49, 0.0  ;;  %v837_v21 = vpop.permute.xlu1 %836 }
 0x48f   :  { %v739_v55 = vmax.f32 %v715_v51, 0.0 }
 0x490   :  { %v749_v56 = vpack.c.bf16 %v741_v53, %v740_v52  ;;  %1894 = vmatpush3.bf16.msra.mxu1 %v747_v40  ;;  %v842_v22 = vpop.permute.xlu0 %841 }
 0x491   :  { %v748_v57 = vpack.c.bf16 %v739_v55, %v738_v54 }
 0x492   :  { %v2481_v23 = vpop.permute.xlu1 %926 }
 0x493   :  { %1895 = vmatprep.subr.bf16.mxu1 %v748_v57 }
 0x494   :  { %1896 = vmatpush3.bf16.msra.mxu1 %v748_v57  ;;  %v2483_v24 = vpop.permute.xlu0 %931 }
 0x495   :  { %1897 = vmatprep.subr.bf16.mxu1 %v749_v56 }
 0x496   :  { %v847_v25 = vpop.permute.xlu1 %846 }
 0x498   :  { %1898 = vmatpush3.bf16.msra.mxu1 %v749_v56  ;;  %v852_v26 = vpop.permute.xlu0 %851 }
 0x499   :  { %1931 = vmatprep.subr.bf16.mxu1 %v2012_v1 }
 0x49a   :  { %v2485_v27 = vpop.permute.xlu1 %936 }
 0x49b   :  { %1900 = vmatmul.mubr.bf16.vlgmr.msra.gmra.mrb[12].mxu1 %v1972_v58 }
 0x49c   :  { %1903 = vmatprep.mubr.bf16.mxu1 %v1973_v59  ;;  %v2487_v28 = vpop.permute.xlu0 %941 }
 0x49e   :  { %v857_v29 = vpop.permute.xlu1 %856 }
 0x4a0   :  { %v862_v30 = vpop.permute.xlu0 %861 }
 0x4a2   :  { %v2489_v31 = vpop.permute.xlu1 %946 }
 0x4a3   :  { %1904 = vmatmul.mubr.bf16.gmra.mrb[16].mxu1 %v1974_v60 }
 0x4a4   :  { %1907 = vmatprep.mubr.bf16.mxu1 %v1975_v61  ;;  %v2491_v32 = vpop.permute.xlu0 %951 }
 0x4a6   :  { %v867_v33 = vpop.permute.xlu1 %866 }
 0x4a8   :  { %v872_v37 = vpop.permute.xlu0 %871 }
 0x4aa   :  { %v2493_v45 = vpop.permute.xlu1 %956 }
 0x4ab   :  { %1908 = vmatmul.mubr.bf16.gmra.mrb[20].mxu1 %v1976_v62 }
 0x4ac   :  { %1911 = vmatprep.mubr.bf16.mxu1 %v1977_v63  ;;  %v2497_v49 = vpop.permute.xlu0 %961 }
 0x4ae   :  { %v877_v58 = vpop.permute.xlu1 %876 }
 0x4b0   :  { %v882_v62 = vpop.permute.xlu0 %881 }
 0x4b3   :  { %1912 = vmatmul.mubr.bf16.gmra.mrb[24].mxu1 %v1978_v0 }
 0x4b4   :  { %1915 = vmatprep.mubr.bf16.mxu1 %v1979_v2  ;;  %v2507_v14 = vpop.permute.xlu0 %971 }
 0x4bb   :  { %1916 = vmatmul.mubr.bf16.gmra.mrb[28].mxu1 %v1980_v3 }
 0x4bc   :  { %1919 = vmatprep.mubr.bf16.mxu1 %v1981_v4 }
 0x4c3   :  { %1920 = vmatmul.mubr.bf16.gmra.mrb[32].mxu1 %v1982_v5 }
 0x4c4   :  { %1923 = vmatprep.mubr.bf16.mxu1 %v1983_v6 }
 0x4cb   :  { %1924 = vmatmul.mubr.bf16.gmra.mrb[36].mxu1 %v1984_v7  ;;  %v2505_v7 = vpop.permute.xlu1 %966 }
 0x4cc   :  { %1927 = vmatprep.mubr.bf16.mxu1 %v1985_v8 }
 0x4d3   :  { %1928 = vmatmul.mubr.bf16.gmra.mrb[40].mxu1 %v1986_v9 }
 0x4d4   :  { %1947 = vmatprep.mubr.msk.bf16.mxu1 %vm2013_vm1, %v2012_v1 }
 0x56e   :  { %v1901_v34 = vpop.f32.mrb[12].mxu1 }
 0x56f   :  { %v1113_v35 = vadd.f32 %v1901_v34, %v827_v17  ;;  %v1104_v36 = vpop.f32.mrb[13].mxu1  ;;  %v887_v34 = vpop.permute.xlu1 %886 }
 0x570   :  { %v1105_v38 = vadd.f32 %v1104_v36, %v817_v12  ;;  %v1902_v39 = vpop.f32.mrb[14].mxu1 }
 0x571   :  { %v1116_v40 = vadd.f32 %v1902_v39, %v832_v18  ;;  %v1107_v41 = vpop.f32.mrb[15].mxu1  ;;  %v1233_v43 = vmax.f32 %v1113_v35, 0.0  ;;  %v892_v39 = vpop.permute.xlu0 %891 }
 0x572   :  { %v1108_v42 = vadd.f32 %v1107_v41, %v822_v13  ;;  %v1231_v46 = vmax.f32 %v1105_v38, 0.0 }
 0x573   :  { %v1234_v44 = vmax.f32 %v1116_v40, 0.0 }
 0x574   :  { %v1232_v47 = vmax.f32 %v1108_v42, 0.0 }
 0x575   :  { %v2495_v48 = vpack.c.bf16 %v1234_v44, %v1233_v43 }
 0x576   :  { %v2499_v50 = vpack.c.bf16 %v1232_v47, %v1231_v46  ;;  %v1905_v51 = vpop.f32.mrb[16].mxu1 }
 0x577   :  { %v1129_v52 = vadd.f32 %v1905_v51, %v847_v25  ;;  %v1120_v53 = vpop.f32.mrb[17].mxu1 }
 0x578   :  { %v1121_v54 = vadd.f32 %v1120_v53, %v837_v21  ;;  %v1906_v55 = vpop.f32.mrb[18].mxu1 }
 0x579   :  { %v1132_v56 = vadd.f32 %v1906_v55, %v852_v26  ;;  %v1123_v57 = vpop.f32.mrb[19].mxu1  ;;  %v1237_v60 = vmax.f32 %v1129_v52, 0.0 }
 0x57a   :  { %v1124_v59 = vadd.f32 %v1123_v57, %v842_v22  ;;  %v1235_v63 = vmax.f32 %v1121_v54, 0.0 }
 0x57b   :  { %v1238_v61 = vmax.f32 %v1132_v56, 0.0 }
 0x57c   :  { %v1236_v0 = vmax.f32 %v1124_v59, 0.0 }
 0x57d   :  { %v2501_v2 = vpack.c.bf16 %v1238_v61, %v1237_v60 }
 0x57e   :  { %v2503_v3 = vpack.c.bf16 %v1236_v0, %v1235_v63  ;;  %v1909_v4 = vpop.f32.mrb[20].mxu1 }
 0x57f   :  { %v1145_v5 = vadd.f32 %v1909_v4, %v867_v33  ;;  %v1136_v6 = vpop.f32.mrb[21].mxu1 }
 0x580   :  { %v1137_v8 = vadd.f32 %v1136_v6, %v857_v29  ;;  %v1910_v9 = vpop.f32.mrb[22].mxu1 }
 0x581   :  { %v1148_v12 = vadd.f32 %v1910_v9, %v872_v37  ;;  %v1139_v13 = vpop.f32.mrb[23].mxu1  ;;  %v1241_v18 = vmax.f32 %v1145_v5, 0.0 }
 0x582   :  { %v1140_v17 = vadd.f32 %v1139_v13, %v862_v30  ;;  %v1239_v22 = vmax.f32 %v1137_v8, 0.0 }
 0x583   :  { %v1242_v21 = vmax.f32 %v1148_v12, 0.0 }
 0x584   :  { %v1240_v25 = vmax.f32 %v1140_v17, 0.0 }
 0x585   :  { %v2509_v26 = vpack.c.bf16 %v1242_v21, %v1241_v18 }
 0x586   :  { %v2511_v35 = vpack.c.bf16 %v1240_v25, %v1239_v22  ;;  %v1913_v33 = vpop.f32.mrb[24].mxu1 }
 0x587   :  { %v1161_v36 = vadd.f32 %v1913_v33, %v887_v34  ;;  %v1152_v38 = vpop.f32.mrb[25].mxu1 }
 0x588   :  { %v1153_v29 = vadd.f32 %v1152_v38, %v877_v58  ;;  %v1914_v40 = vpop.f32.mrb[26].mxu1 }
 0x589   :  { %v1164_v37 = vadd.f32 %v1914_v40, %v892_v39  ;;  %v1155_v41 = vpop.f32.mrb[27].mxu1  ;;  %v1245_v43 = vmax.f32 %v1161_v36, 0.0 }
 0x58a   :  { %v1156_v42 = vadd.f32 %v1155_v41, %v882_v62  ;;  %v1243_v44 = vmax.f32 %v1153_v29, 0.0 }
 0x58b   :  { %v1246_v30 = vmax.f32 %v1164_v37, 0.0 }
 0x58c   :  { %v1244_v46 = vmax.f32 %v1156_v42, 0.0 }
 0x58d   :  { %v2513_v47 = vpack.c.bf16 %v1246_v30, %v1245_v43 }
 0x58e   :  { %v2515_v51 = vpack.c.bf16 %v1244_v46, %v1243_v44  ;;  %v1917_v52 = vpop.f32.mrb[28].mxu1 }
 0x58f   :  { %v1177_v53 = vadd.f32 %v1917_v52, %v2473_v15  ;;  %v1168_v54 = vpop.f32.mrb[29].mxu1  ;;  %v1999_v52 = vld [vmem:[%s2614_s7 + $0x44] ss:$8 sps:$4 sm:$0xff]  }
 0x590   :  { %v1169_v55 = vadd.f32 %v1168_v54, %v2466_v10  ;;  %v1918_v56 = vpop.f32.mrb[30].mxu1  ;;  %v2002_v54 = vld [vmem:[%s2614_s7 + $0x54] ss:$8 sps:$4 sm:$0xff]  }
 0x591   :  { %v1180_v57 = vadd.f32 %v1918_v56, %v2475_v16  ;;  %v1171_v58 = vpop.f32.mrb[31].mxu1  ;;  %v1249_v60 = vmax.f32 %v1177_v53, 0.0  ;;  %v2001_v53 = vld [vmem:[%s2614_s7 + $0x40] ss:$8 sps:$4 sm:$0xff]   ;;  %v2005_v56 = vld [vmem:[%s2614_s7 + $0x64] ss:$8 sps:$4 sm:$0xff]  }
 0x592   :  { %v1172_v59 = vadd.f32 %v1171_v58, %v2468_v11  ;;  %v1247_v62 = vmax.f32 %v1169_v55, 0.0  ;;  %v2004_v55 = vld [vmem:[%s2614_s7 + $0x50] ss:$8 sps:$4 sm:$0xff]   ;;  %v2008_v58 = vld [vmem:[%s2614_s7 + $0x74] ss:$8 sps:$4 sm:$0xff]  }
 0x593   :  { %v1250_v61 = vmax.f32 %v1180_v57, 0.0  ;;  %v2007_v57 = vld [vmem:[%s2614_s7 + $0x60] ss:$8 sps:$4 sm:$0xff]  }
 0x594   :  { %v1248_v63 = vmax.f32 %v1172_v59, 0.0  ;;  %v2010_v59 = vld [vmem:[%s2614_s7 + $0x70] ss:$8 sps:$4 sm:$0xff]  }
 0x595   :  { %v1272_v0 = vpack.c.bf16 %v1250_v61, %v1249_v60 }
 0x596   :  { %v1271_v4 = vpack.c.bf16 %v1248_v63, %v1247_v62  ;;  %v1921_v5 = vpop.f32.mrb[32].mxu1 }
 0x597   :  { %v1193_v6 = vadd.f32 %v1921_v5, %v2481_v23  ;;  %v1184_v8 = vpop.f32.mrb[33].mxu1 }
 0x598   :  { %v1185_v15 = vadd.f32 %v1184_v8, %v2477_v19  ;;  %v1922_v9 = vpop.f32.mrb[34].mxu1  ;;  %1756 = vmatprep.subr.bf16.mxu0 %v1271_v4  ;;  %v1319_v8 = vpop.permute.xlu0 %1318 }
 0x599   :  { %v1196_v10 = vadd.f32 %v1922_v9, %v2483_v24  ;;  %v1187_v16 = vpop.f32.mrb[35].mxu1  ;;  %1757 = vmatpush3.bf16.msra.mxu0 %v2499_v50  ;;  %v1253_v12 = vmax.f32 %v1193_v6, 0.0 }
 0x59a   :  { %v1188_v11 = vadd.f32 %v1187_v16, %v2479_v20  ;;  %1758 = vmatprep.subr.bf16.mxu0 %v1272_v0  ;;  %v1251_v17 = vmax.f32 %v1185_v15, 0.0  ;;  %v1314_v0 = vpop.permute.xlu1 %1313 }
 0x59b   :  { %v1254_v13 = vmax.f32 %v1196_v10, 0.0 }
 0x59c   :  { %v1252_v18 = vmax.f32 %v1188_v11, 0.0 }
 0x59d   :  { %v1274_v21 = vpack.c.bf16 %v1254_v13, %v1253_v12  ;;  %1759 = vmatpush3.bf16.msra.mxu0 %v2495_v48 }
 0x59e   :  { %v1273_v23 = vpack.c.bf16 %v1252_v18, %v1251_v17  ;;  %v1925_v22 = vpop.f32.mrb[36].mxu1  ;;  %v1324_v18 = vpop.permute.xlu1 %1323 }
 0x59f   :  { %v1209_v19 = vadd.f32 %v1925_v22, %v2489_v31  ;;  %v1200_v25 = vpop.f32.mrb[37].mxu1 }
 0x5a0   :  { %v1201_v24 = vadd.f32 %v1200_v25, %v2485_v27  ;;  %v1926_v34 = vpop.f32.mrb[38].mxu1  ;;  %1760 = vmatprep.subr.bf16.mxu0 %v1273_v23 }
 0x5a1   :  { %v1212_v50 = vadd.f32 %v1926_v34, %v2491_v32  ;;  %v1203_v20 = vpop.f32.mrb[39].mxu1  ;;  %1761 = vmatpush3.bf16.msra.mxu0 %v2503_v3  ;;  %v1257_v36 = vmax.f32 %v1209_v19, 0.0  ;;  %v1329_v19 = vpop.permute.xlu0 %1328 }
 0x5a2   :  { %v1204_v33 = vadd.f32 %v1203_v20, %v2487_v28  ;;  %1762 = vmatprep.subr.bf16.mxu0 %v1274_v21  ;;  %v1255_v48 = vmax.f32 %v1201_v24, 0.0 }
 0x5a3   :  { %v1258_v38 = vmax.f32 %v1212_v50, 0.0 }
 0x5a4   :  { %v1256_v39 = vmax.f32 %v1204_v33, 0.0 }
 0x5a5   :  { %v1276_v29 = vpack.c.bf16 %v1258_v38, %v1257_v36  ;;  %1763 = vmatpush3.bf16.msra.mxu0 %v2501_v2 }
 0x5a6   :  { %v1275_v31 = vpack.c.bf16 %v1256_v39, %v1255_v48  ;;  %v1929_v40 = vpop.f32.mrb[40].mxu1  ;;  %v1334_v48 = vpop.permute.xlu1 %1333 }
 0x5a7   :  { %v1225_v27 = vadd.f32 %v1929_v40, %v2505_v7  ;;  %v1216_v37 = vpop.f32.mrb[41].mxu1  ;;  %v1339_v40 = vpop.permute.xlu0 %1338 }
 0x5a8   :  { %v1217_v32 = vadd.f32 %v1216_v37, %v2493_v45  ;;  %v1930_v41 = vpop.f32.mrb[42].mxu1  ;;  %1764 = vmatprep.subr.bf16.mxu0 %v1275_v31  ;;  %v1987_v45 = vld [vmem:[%s2614_s7] ss:$8 sps:$4 sm:$0xff]  }
 0x5a9   :  { %v1228_v3 = vadd.f32 %v1930_v41, %v2507_v14  ;;  %v1219_v28 = vpop.f32.mrb[43].mxu1  ;;  %1765 = vmatpush3.bf16.msra.mxu0 %v2511_v35  ;;  %v1261_v43 = vmax.f32 %v1225_v27, 0.0  ;;  %v1992_v14 = vld [vmem:[%s2614_s7 + $0x10] ss:$8 sps:$4 sm:$0xff]   ;;  %v1995_v35 = vld [vmem:[%s2614_s7 + $0x20] ss:$8 sps:$4 sm:$0xff]  }
 0x5aa   :  { %v1220_v42 = vadd.f32 %v1219_v28, %v2497_v49  ;;  %1766 = vmatprep.subr.bf16.mxu0 %v1276_v29  ;;  %v1259_v2 = vmax.f32 %v1217_v32, 0.0  ;;  %v1990_v49 = vld [vmem:[%s2614_s7 + $0x14] ss:$8 sps:$4 sm:$0xff]  }
 0x5ab   :  { %v1262_v30 = vmax.f32 %v1228_v3, 0.0 }
 0x5ac   :  { %v1260_v44 = vmax.f32 %v1220_v42, 0.0 }
 0x5ad   :  { %v1278_v46 = vpack.c.bf16 %v1262_v30, %v1261_v43  ;;  %1767 = vmatpush3.bf16.msra.mxu0 %v2509_v26  ;;  %v1993_v26 = vld [vmem:[%s2614_s7 + $0x24] ss:$8 sps:$4 sm:$0xff]   ;;  %v1344_v30 = vpop.permute.xlu1 %1343 }
 0x5ae   :  { %v1277_v7 = vpack.c.bf16 %v1260_v44, %v1259_v2 }
 0x5b0   :  { %1768 = vmatprep.subr.bf16.mxu0 %v1277_v7  ;;  %v1349_v7 = vpop.permute.xlu0 %1348 }
 0x5b1   :  { %1769 = vmatpush3.bf16.msra.mxu0 %v2515_v51  ;;  %v1998_v51 = vld [vmem:[%s2614_s7 + $0x30] ss:$8 sps:$4 sm:$0xff]  }
 0x5b2   :  { %1770 = vmatprep.subr.bf16.mxu0 %v1278_v46 }
 0x5b5   :  { %1771 = vmatpush3.bf16.msra.mxu0 %v2513_v47  ;;  %v1996_v47 = vld [vmem:[%s2614_s7 + $0x34] ss:$8 sps:$4 sm:$0xff]  }
 0x5b8   :  { %1504 = vmatmul.mubr.bf16.vlgmr.msra.gmra.mrb[24].mxu0 %v1987_v45 }
 0x5b9   :  { %1511 = vmatprep.mubr.bf16.mxu0 %v1990_v49 }
 0x5c0   :  { %1512 = vmatmul.mubr.bf16.gmra.mrb[28].mxu0 %v1992_v14 }
 0x5c1   :  { %1519 = vmatprep.mubr.bf16.mxu0 %v1993_v26 }
 0x5c8   :  { %1520 = vmatmul.mubr.bf16.gmra.mrb[32].mxu0 %v1995_v35 }
 0x5c9   :  { %1527 = vmatprep.mubr.bf16.mxu0 %v1996_v47 }
 0x5d0   :  { %1528 = vmatmul.mubr.bf16.gmra.mrb[36].mxu0 %v1998_v51 }
 0x5d1   :  { %1535 = vmatprep.mubr.bf16.mxu0 %v1999_v52 }
 0x5d8   :  { %1536 = vmatmul.mubr.bf16.gmra.mrb[40].mxu0 %v2001_v53  ;;  %v1354_v53 = vpop.permute.xlu1 %1353 }
 0x5d9   :  { %1543 = vmatprep.mubr.bf16.mxu0 %v2002_v54 }
 0x5e0   :  { %1544 = vmatmul.mubr.bf16.gmra.mrb[44].mxu0 %v2004_v55 }
 0x5e1   :  { %1551 = vmatprep.mubr.bf16.mxu0 %v2005_v56 }
 0x5e8   :  { %1552 = vmatmul.mubr.bf16.gmra.mrb[48].mxu0 %v2007_v57  ;;  %v1359_v57 = vpop.permute.xlu0 %1358 }
 0x5e9   :  { %1559 = vmatprep.mubr.bf16.mxu0 %v2008_v58 }
 0x5f0   :  { %1560 = vmatmul.mubr.bf16.gmra.mrb[52].mxu0 %v2010_v59 }
 0x68b   :  { %v1772_v60 = vpop.f32.mrb[24].mxu0 }
 0x68c   :  { %v1773_v61 = vpop.f32.mrb[25].mxu0 }
 0x68d   :  { %v1774_v62 = vadd.f32 %v1773_v61, %v1772_v60  ;;  %v1775_v63 = vpop.f32.mrb[26].mxu0 }
 0x68e   :  { %v1776_v4 = vpop.f32.mrb[27].mxu0 }
 0x68f   :  { %v1506_v5 = vadd.f32 %v1774_v62, %v1314_v0  ;;  %v1777_v6 = vadd.f32 %v1776_v4, %v1775_v63 }
 0x691   :  { %v1509_v15 = vadd.f32 %v1777_v6, %v1319_v8  ;;  %v1568_v9 = vmax.f32 %v1506_v5, 0.0  ;;  %v1364_v5 = vpop.permute.xlu1 %1363 }
 0x693   :  { %v1569_v10 = vmax.f32 %v1509_v15, 0.0  ;;  %v1778_v16 = vpop.f32.mrb[28].mxu0 }
 0x694   :  { %v1779_v11 = vpop.f32.mrb[29].mxu0 }
 0x695   :  { %v1584_v12 = vpack.c.bf16 %v1569_v10, %v1568_v9  ;;  %v1780_v13 = vadd.f32 %v1779_v11, %v1778_v16  ;;  %v1781_v17 = vpop.f32.mrb[30].mxu0  ;;  %v1369_v9 = vpop.permute.xlu0 %1368 }
 0x696   :  { %v1782_v21 = vpop.f32.mrb[31].mxu0 }
 0x697   :  { %v1514_v23 = vadd.f32 %v1780_v13, %v1324_v18  ;;  %v1783_v22 = vadd.f32 %v1782_v21, %v1781_v17  ;;  %1932 = vmatpush3.bf16.msra.mxu1 %v1584_v12 }
 0x698   :  { %1933 = vmatprep.subr.bf16.mxu1 %v2012_v1 }
 0x699   :  { %v1517_v25 = vadd.f32 %v1783_v22, %v1329_v19  ;;  %v1570_v24 = vmax.f32 %v1514_v23, 0.0  ;;  %v1374_v23 = vpop.permute.xlu1 %1373 }
 0x69b   :  { %v1571_v34 = vmax.f32 %v1517_v25, 0.0  ;;  %v1784_v50 = vpop.f32.mrb[32].mxu0 }
 0x69c   :  { %v1785_v20 = vpop.f32.mrb[33].mxu0 }
 0x69d   :  { %v1585_v33 = vpack.c.bf16 %v1571_v34, %v1570_v24  ;;  %v1786_v36 = vadd.f32 %v1785_v20, %v1784_v50  ;;  %v1787_v38 = vpop.f32.mrb[34].mxu0  ;;  %v1379_v24 = vpop.permute.xlu0 %1378 }
 0x69e   :  { %v1788_v39 = vpop.f32.mrb[35].mxu0 }
 0x69f   :  { %v1522_v29 = vadd.f32 %v1786_v36, %v1334_v48  ;;  %v1789_v31 = vadd.f32 %v1788_v39, %v1787_v38  ;;  %1934 = vmatpush3.bf16.msra.mxu1 %v1585_v33 }
 0x6a0   :  { %1935 = vmatprep.subr.bf16.mxu1 %v2012_v1 }
 0x6a1   :  { %v1525_v27 = vadd.f32 %v1789_v31, %v1339_v40  ;;  %v1572_v37 = vmax.f32 %v1522_v29, 0.0  ;;  %v1384_v29 = vpop.permute.xlu1 %1383 }
 0x6a3   :  { %v1573_v32 = vmax.f32 %v1525_v27, 0.0  ;;  %v1790_v41 = vpop.f32.mrb[36].mxu0 }
 0x6a4   :  { %v1791_v3 = vpop.f32.mrb[37].mxu0 }
 0x6a5   :  { %v1586_v28 = vpack.c.bf16 %v1573_v32, %v1572_v37  ;;  %v1792_v42 = vadd.f32 %v1791_v3, %v1790_v41  ;;  %v1793_v43 = vpop.f32.mrb[38].mxu0  ;;  %v1389_v37 = vpop.permute.xlu0 %1388 }
 0x6a6   :  { %v1794_v2 = vpop.f32.mrb[39].mxu0 }
 0x6a7   :  { %v1530_v44 = vadd.f32 %v1792_v42, %v1344_v30  ;;  %v1795_v46 = vadd.f32 %v1794_v2, %v1793_v43  ;;  %1936 = vmatpush3.bf16.msra.mxu1 %v1586_v28  ;;  %v1592_v42 = vld [vmem:[%s2615_s8] sm:$0xf]  ;;  %v1597_v43 = vpop.permute.xlu1 %1596 }
 0x6a8   :  { %1937 = vmatprep.subr.bf16.mxu1 %v2012_v1 }
 0x6a9   :  { %v1533_v45 = vadd.f32 %v1795_v46, %v1349_v7  ;;  %v1574_v49 = vmax.f32 %v1530_v44, 0.0 }
 0x6ab   :  { %v1575_v14 = vmax.f32 %v1533_v45, 0.0  ;;  %v1796_v26 = vpop.f32.mrb[40].mxu0 }
 0x6ac   :  { %v1797_v35 = vpop.f32.mrb[41].mxu0 }
 0x6ad   :  { %v1587_v47 = vpack.c.bf16 %v1575_v14, %v1574_v49  ;;  %v1798_v51 = vadd.f32 %v1797_v35, %v1796_v26  ;;  %v1799_v52 = vpop.f32.mrb[42].mxu0 }
 0x6ae   :  { %v1800_v54 = vpop.f32.mrb[43].mxu0 }
 0x6af   :  { %v1538_v55 = vadd.f32 %v1798_v51, %v1354_v53  ;;  %v1801_v56 = vadd.f32 %v1800_v54, %v1799_v52  ;;  %1938 = vmatpush3.bf16.msra.mxu1 %v1587_v47 }
 0x6b0   :  { %1939 = vmatprep.subr.bf16.mxu1 %v2012_v1 }
 0x6b1   :  { %v1541_v58 = vadd.f32 %v1801_v56, %v1359_v57  ;;  %v1576_v59 = vmax.f32 %v1538_v55, 0.0 }
 0x6b3   :  { %v1577_v60 = vmax.f32 %v1541_v58, 0.0  ;;  %v1802_v61 = vpop.f32.mrb[44].mxu0 }
 0x6b4   :  { %v1803_v62 = vpop.f32.mrb[45].mxu0 }
 0x6b5   :  { %v1588_v63 = vpack.c.bf16 %v1577_v60, %v1576_v59  ;;  %v1804_v0 = vadd.f32 %v1803_v62, %v1802_v61  ;;  %v1805_v4 = vpop.f32.mrb[46].mxu0 }
 0x6b6   :  { %v1806_v6 = vpop.f32.mrb[47].mxu0 }
 0x6b7   :  { %v1546_v8 = vadd.f32 %v1804_v0, %v1364_v5  ;;  %v1807_v15 = vadd.f32 %v1806_v6, %v1805_v4  ;;  %1940 = vmatpush3.bf16.msra.mxu1 %v1588_v63 }
 0x6b8   :  { %1941 = vmatprep.subr.bf16.mxu1 %v2012_v1 }
 0x6b9   :  { %v1549_v10 = vadd.f32 %v1807_v15, %v1369_v9  ;;  %v1578_v16 = vmax.f32 %v1546_v8, 0.0 }
 0x6bb   :  { %v1579_v11 = vmax.f32 %v1549_v10, 0.0  ;;  %v1808_v12 = vpop.f32.mrb[48].mxu0 }
 0x6bc   :  { %v1809_v13 = vpop.f32.mrb[49].mxu0 }
 0x6bd   :  { %v1589_v17 = vpack.c.bf16 %v1579_v11, %v1578_v16  ;;  %v1810_v18 = vadd.f32 %v1809_v13, %v1808_v12  ;;  %v1811_v21 = vpop.f32.mrb[50].mxu0 }
 0x6be   :  { %v1812_v22 = vpop.f32.mrb[51].mxu0 }
 0x6bf   :  { %v1554_v19 = vadd.f32 %v1810_v18, %v1374_v23  ;;  %v1813_v25 = vadd.f32 %v1812_v22, %v1811_v21  ;;  %1942 = vmatpush3.bf16.msra.mxu1 %v1589_v17 }
 0x6c0   :  { %1943 = vmatprep.subr.bf16.mxu1 %v2012_v1 }
 0x6c1   :  { %v1557_v34 = vadd.f32 %v1813_v25, %v1379_v24  ;;  %v1580_v50 = vmax.f32 %v1554_v19, 0.0 }
 0x6c3   :  { %v1581_v20 = vmax.f32 %v1557_v34, 0.0  ;;  %v1814_v33 = vpop.f32.mrb[52].mxu0 }
 0x6c4   :  { %v1815_v36 = vpop.f32.mrb[53].mxu0 }
 0x6c5   :  { %v1590_v38 = vpack.c.bf16 %v1581_v20, %v1580_v50  ;;  %v1816_v48 = vadd.f32 %v1815_v36, %v1814_v33  ;;  %v1817_v39 = vpop.f32.mrb[54].mxu0 }
 0x6c6   :  { %v1818_v31 = vpop.f32.mrb[55].mxu0 }
 0x6c7   :  { %v1562_v40 = vadd.f32 %v1816_v48, %v1384_v29  ;;  %v1819_v27 = vadd.f32 %v1818_v31, %v1817_v39  ;;  %1944 = vmatpush3.bf16.msra.mxu1 %v1590_v38 }
 0x6c8   :  { %1945 = vmatprep.subr.bf16.mxu1 %v2012_v1 }
 0x6c9   :  { %v1565_v32 = vadd.f32 %v1819_v27, %v1389_v37  ;;  %v1582_v41 = vmax.f32 %v1562_v40, 0.0 }
 0x6cb   :  { %v1583_v3 = vmax.f32 %v1565_v32, 0.0 }
 0x6cd   :  { %v1591_v28 = vpack.c.bf16 %v1583_v3, %v1582_v41 }
 0x6cf   :  { %1946 = vmatpush3.bf16.msra.mxu1 %v1591_v28 }
 0x6d2   :  { %1948 = vmatmul.mubr.bf16.vlgmr.msra.gmra.mrb[44].mxu1 %v1592_v42 }
 0x7a5   :  { %v1633_v30 = vpop.f32.mrb[44].mxu1 }
 0x7a6   :  { %v1634_v2 = vadd.f32 %v1633_v30, %v1597_v43  ;;  %v1949_v44 = vpop.f32.mrb[45].mxu1 }
 0x7a7   :  { %v1636_v46 = vpop.f32.mrb[46].mxu1 }
 0x7a8   :  { %1639 = vst [vmem:[%s2616_s17] sm:$0xff] %v1634_v2  ;;  %v1950_v1 = vpop.f32.mrb[47].mxu1 }

</bundles_post_ra>
